<compile_context>
chip_gen: v7x
topology: tpu7x:2x2x1
jax: 0.10.0
libtpu: 0.0.40
codegen_flags: <defaults>
</compile_context>

<pallas_src>
import numpy as np
import jax
import jax.numpy as jnp
from jax import lax
from jax.experimental import pallas as pl
from jax.experimental.pallas import tpu as pltpu


# ----------------------------------------------------------------------------
# Fused Pallas kernel: grid = (batch_group, layer); hidden carried in out_ref.
# ----------------------------------------------------------------------------
def syngcn_fused_kernel(cat_mask_ref, w_ref, b_ref, hidden_in_ref, out_ref):
    l = pl.program_id(1)

    # Initialize the (resident) output block from the initial hidden at the
    # first layer of this batch group; it then carries across the layer axis.
    @pl.when(l == 0)
    def _():
        out_ref[...] = hidden_in_ref[...]

    h = out_ref[0]                                   # (N, D) f32, N = Bg*S
    cm = cat_mask_ref[0][0].astype(jnp.float32)      # (2R, N): [:R]=src one-hot, [R:]=neigh multi-hot
    r = cm.shape[0] // 2
    w = w_ref[0]                                     # (2D, D) = hidden_map.weight.T
    d = w.shape[0] // 2
    bias = b_ref[0]                                  # (1, D)

    sm = cm[:r]                                      # (R, N) source one-hot
    nm = cm[r:]                                      # (R, N) neighbor multi-hot

    # Single gather matmul for both mask halves: (2R, N) @ (N, D).
    feats = jnp.dot(cm, h, preferred_element_type=jnp.float32)       # (2R, D)
    src = feats[:r]                                                  # (R, D)
    ngh_sum = feats[r:]                                              # (R, D)

    # neighbor mean: count neighbors whose hidden row is not all-zero
    # (~torch.all(neigh_features == 0, dim=-1)), clamp(min=1).
    row_nonzero = jnp.any(h != 0, axis=-1, keepdims=True).astype(jnp.float32)   # (N, 1)
    ngh_num = jnp.dot(nm, row_nonzero, preferred_element_type=jnp.float32)      # (R, 1)
    ngh_mean = ngh_sum * pl.reciprocal(jnp.maximum(ngh_num, 1.0), approx=True)  # (R, D)

    # hidden_map(concat([src, ngh_mean])) without the lane concat: two
    # accumulated K=D matmuls over the two halves of the weight, + leaky_relu.
    z = (jnp.dot(src, w[:d], preferred_element_type=jnp.float32)
         + jnp.dot(ngh_mean, w[d:], preferred_element_type=jnp.float32)
         + bias)                                                                 # (R, D)
    act = jnp.where(z > 0.0, z, 0.01 * z)                                        # F.leaky_relu

    # Delta scatter back into the sequence: sm^T @ (act - old_src).  Source
    # rows are one-hot and unique per layer (asserted host-side), so this is
    # an exact overwrite; padded all-zero rows contribute nothing.
    dn = (((0,), (0,)), ((), ()))
    delta = lax.dot_general(sm, act - src, dn, preferred_element_type=jnp.float32)   # (N, D)
    out_ref[0] = h + delta


# ----------------------------------------------------------------------------
# Host-side glue: replicate SyntacticGCN.forward's python mask-building loop,
# lowered to dense int8 masks over the (per batch-group) flattened sequence.
# ----------------------------------------------------------------------------
def build_group_masks(aspect_mask, adj_dict_list, num_layers, seq_len, num_groups):
    """Per (group, layer): one row per (batch-in-group, source node).
       rows [0:R)  -> one-hot source position
       rows [R:2R) -> multi-hot neighbor positions
    Returns (cat_mask[G, L, 2R, Bg*seq_len] int8, R)."""
    B = aspect_mask.shape[0]
    assert B % num_groups == 0
    Bg = B // num_groups

    src_nodes = [[[i for i in range(seq_len) if aspect_mask[b, i] == 1]
                  for b in range(B)]]
    layer_rows = []
    for l in range(num_layers):
        rows, nxt = [], []
        for b in range(B):
            idxs = src_nodes[l][b]
            neigh = [adj_dict_list[b].get(i, []) for i in idxs]
            nxt.append(sorted(set(n for lst in neigh for n in lst)))
            rows.extend((b, i, nl) for i, nl in zip(idxs, neigh))
        src_nodes.append(nxt)
        layer_rows.append(rows)

    # Rows needed per (group, layer); pad R to a sublane multiple.
    max_rows = 1
    for rows in layer_rows:
        per_group = [0] * num_groups
        for (b, _, _) in rows:
            per_group[b // Bg] += 1
        max_rows = max(max_rows, max(per_group))
    R = max(8, -(-max_rows // 8) * 8)

    Ng = Bg * seq_len
    cat_mask = np.zeros((num_groups, num_layers, 2 * R, Ng), np.int8)
    for l, rows in enumerate(layer_rows):
        # scatter-by-matmul requires each source position to appear at most once
        assert len({(b, i) for b, i, _ in rows}) == len(rows)
        counters = [0] * num_groups
        for (b, i, nlst) in rows:
            g = b // Bg
            ri = counters[g]
            counters[g] += 1
            col = (b % Bg) * seq_len
            cat_mask[g, l, ri, col + i] = 1
            for n in nlst:
                cat_mask[g, l, R + ri, col + n] = 1
    return cat_mask, R


def syntactic_gcn_forward(x, aspect_mask, adj_dict_list, ws, bs, num_groups=None):
    """Full SyntacticGCN forward (all layers fused into one pallas_call)."""
    B, S, D = x.shape
    L = len(ws)
    if num_groups is None:
        num_groups = 2 if B % 2 == 0 else 1     # use both TensorCores on v7x

    cat_mask, R = build_group_masks(np.asarray(aspect_mask), adj_dict_list, L, S, num_groups)
    Bg = B // num_groups
    Ng = Bg * S

    # Layers are applied outermost neighborhood first: l = L-1, ..., 0.
    order = list(range(L - 1, -1, -1))
    cat_stack = jnp.asarray(cat_mask[:, order])                      # (G, L, 2R, Ng) int8
    w_stack = jnp.stack([ws[l] for l in order])                      # (L, 2D, D)
    b_stack = jnp.stack([bs[l].reshape(1, D) for l in order])        # (L, 1, D)
    h_init = x.reshape(num_groups, Ng, D).astype(jnp.float32)        # (G, Ng, D)

    # VMEM residency estimate: resident output + double-buffered inputs.
    hidden_bytes = Ng * D * 4
    est = (hidden_bytes                    # out block (resident carry)
           + 2 * hidden_bytes              # hidden_in (double-buffered)
           + 2 * (2 * R * Ng)              # int8 mask stream (double-buffered)
           + 2 * (2 * D * D * 4)           # hidden_map weight (double-buffered)
           + 2 * (8 * D * 4))              # bias (padded)
    vmem_limit = int(max(16 << 20, min(64 << 20, 2 * est + (4 << 20))))

    out = pl.pallas_call(
        syngcn_fused_kernel,
        out_shape=jax.ShapeDtypeStruct((num_groups, Ng, D), jnp.float32),
        grid_spec=pltpu.PrefetchScalarGridSpec(
            num_scalar_prefetch=0,
            grid=(num_groups, L),                                      # (parallel, sequential)
            in_specs=[
                pl.BlockSpec((1, 1, 2 * R, Ng), lambda g, l: (g, l, 0, 0)),   # per-layer int8 masks
                pl.BlockSpec((1, 2 * D, D), lambda g, l: (l, 0, 0)),          # hidden_map weight^T
                pl.BlockSpec((1, 1, D), lambda g, l: (l, 0, 0)),              # hidden_map bias
                pl.BlockSpec((1, Ng, D), lambda g, l: (g, 0, 0)),             # initial hidden
            ],
            out_specs=pl.BlockSpec((1, Ng, D), lambda g, l: (g, 0, 0)),       # resident carry/output
        ),
        compiler_params=pltpu.CompilerParams(
            dimension_semantics=("parallel", "arbitrary"),
            vmem_limit_bytes=vmem_limit),
    )(cat_stack, w_stack, b_stack, h_init)
    return out.reshape(B, S, D)


# ----------------------------------------------------------------------------
# Independent NumPy reference: direct per-node re-implementation of the
# PyTorch forward (mean aggregation, 'concat' hidden aggregation, eval mode).
# ----------------------------------------------------------------------------
def ref_forward_numpy(x, aspect_mask, adj_dict_list, ws, bs):
    B, S, D = x.shape
    L = len(ws)
    hidden = np.array(x, np.float32)
    src_nodes = [[[i for i in range(S) if aspect_mask[b, i] == 1] for b in range(B)]]
    for l in range(L):
        nxt = []
        for b in range(B):
            neigh = [adj_dict_list[b].get(i, []) for i in src_nodes[l][b]]
            nxt.append(sorted(set(n for lst in neigh for n in lst)))
        src_nodes.append(nxt)
    for l in range(L - 1, -1, -1):
        w, bias = np.asarray(ws[l]), np.asarray(bs[l])
        new_hidden = hidden.copy()
        for b in range(B):
            for i in src_nodes[l][b]:
                nlst = sorted(set(adj_dict_list[b].get(i, [])))
                src_feat = hidden[b, i]
                if nlst:
                    nsum = hidden[b, nlst].sum(axis=0)
                    ncnt = sum(1 for n in nlst if np.any(hidden[b, n] != 0))
                else:
                    nsum = np.zeros(D, np.float32)
                    ncnt = 0
                mean = nsum / max(ncnt, 1)
                z = np.concatenate([src_feat, mean]) @ w + bias
                new_hidden[b, i] = np.where(z > 0, z, 0.01 * z)
        hidden = new_hidden
    return hidden


if __name__ == "__main__":
    B, S, D, L = 2, 16, 128, 2      # batch, seq, input_dim==hidden_dim, num_layers

    key = jax.random.PRNGKey(0)
    k_in, k_params = jax.random.split(key)
    x = jax.random.normal(k_in, (B, S, D), jnp.float32)

    # aspect_mask marks the aspect tokens (layer-0 source nodes)
    aspect_mask = np.zeros((B, S), np.int32)
    aspect_mask[0, [3, 4]] = 1
    aspect_mask[1, [7]] = 1

    # deterministic dependency adjacency: simple chain graph per batch element
    adj_dict_list = [
        {i: [j for j in (i - 1, i + 1) if 0 <= j < S] for i in range(S)}
        for _ in range(B)
    ]

    # deterministic hidden_map (nn.Linear(2*D, D)) parameters per layer; stored
    # as weight.T (2D, D) so y = x @ w + b.
    ws, bs = [], []
    for _ in range(L):
        kw, kb, k_params = jax.random.split(k_params, 3)
        bound = float(np.sqrt(1.0 / (2 * D)))
        ws.append(jax.random.uniform(kw, (2 * D, D), jnp.float32, -bound, bound))
        bs.append(jax.random.uniform(kb, (D,), jnp.float32, -bound, bound))

    out = syntactic_gcn_forward(x, aspect_mask, adj_dict_list, ws, bs)
    out = jax.block_until_ready(out)

    ref = ref_forward_numpy(np.asarray(x), aspect_mask, adj_dict_list, ws, bs)

    assert out.shape == (B, S, D)
    assert np.allclose(np.asarray(out), ref, atol=1e-3, rtol=1e-3)
    print("KERNEL_OK")
</pallas_src>

<mosaic_0001>
module attributes {stable_mosaic.version = 11 : i64} {
  func.func @syngcn_fused_kernel(%arg0: i32, %arg1: i32, %arg2: memref<1x1x16x16xi8, #tpu.memory_space<vmem>>, %arg3: memref<1x256x128xf32, #tpu.memory_space<vmem>>, %arg4: memref<1x1x128xf32, #tpu.memory_space<vmem>>, %arg5: memref<1x16x128xf32, #tpu.memory_space<vmem>>, %arg6: memref<1x16x128xf32, #tpu.memory_space<vmem>>) attributes {dimension_semantics = [#tpu.dimension_semantics<parallel>, #tpu.dimension_semantics<arbitrary>], iteration_bounds = array<i64: 2, 2>, scalar_prefetch = 0 : i64, scratch_operands = 0 : i64, tpu.core_type = #tpu.core_type<tc>, window_params = [{transform_indices = @transform_0, window_bounds = array<i64: 1, 1, 16, 16>}, {transform_indices = @transform_1, window_bounds = array<i64: 1, 256, 128>}, {transform_indices = @transform_2, window_bounds = array<i64: 1, 1, 128>}, {transform_indices = @transform_3, window_bounds = array<i64: 1, 16, 128>}, {transform_indices = @transform_4, window_bounds = array<i64: 1, 16, 128>}]} {
    %c0_i32 = arith.constant 0 : i32
    %0 = arith.cmpi eq, %arg1, %c0_i32 : i32
    %1 = arith.extui %0 : i1 to i32
    %c0_i32_0 = arith.constant 0 : i32
    %2 = arith.cmpi ne, %1, %c0_i32_0 : i32
    scf.if %2 {
      %c0_28 = arith.constant 0 : index
      %c0_29 = arith.constant 0 : index
      %c0_30 = arith.constant 0 : index
      %53 = vector.load %arg5[%c0_28, %c0_29, %c0_30] : memref<1x16x128xf32, #tpu.memory_space<vmem>>, vector<1x16x128xf32>
      %c0_31 = arith.constant 0 : index
      %c0_32 = arith.constant 0 : index
      %c0_33 = arith.constant 0 : index
      %54 = vector.load %arg6[%c0_31, %c0_32, %c0_33] : memref<1x16x128xf32, #tpu.memory_space<vmem>>, vector<1x16x128xf32>
      tpu.vector_store %arg6[%c0_31, %c0_32, %c0_33], %53 {strides = array<i32>} : memref<1x16x128xf32, #tpu.memory_space<vmem>>, vector<1x16x128xf32>,
    } else {
    }
    %c0 = arith.constant 0 : index
    %c0_1 = arith.constant 0 : index
    %c0_2 = arith.constant 0 : index
    %3 = vector.load %arg6[%c0, %c0_1, %c0_2] : memref<1x16x128xf32, #tpu.memory_space<vmem>>, vector<1x16x128xf32>
    %4 = vector.shape_cast %3 : vector<1x16x128xf32> to vector<16x128xf32>
    %c0_3 = arith.constant 0 : index
    %c0_4 = arith.constant 0 : index
    %c0_5 = arith.constant 0 : index
    %c0_6 = arith.constant 0 : index
    %5 = vector.load %arg2[%c0_3, %c0_4, %c0_5, %c0_6] : memref<1x1x16x16xi8, #tpu.memory_space<vmem>>, vector<1x1x16x16xi8>
    %6 = vector.shape_cast %5 : vector<1x1x16x16xi8> to vector<1x16x16xi8>
    %7 = vector.shape_cast %6 : vector<1x16x16xi8> to vector<16x16xi8>
    %8 = arith.sitofp %7 : vector<16x16xi8> to vector<16x16xf32>
    %c0_7 = arith.constant 0 : index
    %c0_8 = arith.constant 0 : index
    %c0_9 = arith.constant 0 : index
    %9 = vector.load %arg3[%c0_7, %c0_8, %c0_9] : memref<1x256x128xf32, #tpu.memory_space<vmem>>, vector<1x256x128xf32>
    %10 = vector.shape_cast %9 : vector<1x256x128xf32> to vector<256x128xf32>
    %c0_10 = arith.constant 0 : index
    %c0_11 = arith.constant 0 : index
    %c0_12 = arith.constant 0 : index
    %11 = vector.load %arg4[%c0_10, %c0_11, %c0_12] : memref<1x1x128xf32, #tpu.memory_space<vmem>>, vector<1x1x128xf32>
    %12 = vector.shape_cast %11 : vector<1x1x128xf32> to vector<1x128xf32>
    %13 = vector.extract_strided_slice %8 {offsets = [0, 0], sizes = [8, 16], strides = [1, 1]} : vector<16x16xf32> to vector<8x16xf32>
    %14 = vector.extract_strided_slice %8 {offsets = [8, 0], sizes = [8, 16], strides = [1, 1]} : vector<16x16xf32> to vector<8x16xf32>
    %cst = arith.constant dense<0.000000e+00> : vector<16x128xf32>
    %15 = tpu.matmul %8, %4, %cst {dimension_numbers = #tpu.dot_dimension_numbers<[1], [0], [0], [1], [0, 0, 1, 1], [], []>} : vector<16x16xf32>, vector<16x128xf32>, vector<16x128xf32> -> vector<16x128xf32>
    %16 = vector.extract_strided_slice %15 {offsets = [0, 0], sizes = [8, 128], strides = [1, 1]} : vector<16x128xf32> to vector<8x128xf32>
    %17 = vector.extract_strided_slice %15 {offsets = [8, 0], sizes = [8, 128], strides = [1, 1]} : vector<16x128xf32> to vector<8x128xf32>
    %cst_13 = arith.constant 0.000000e+00 : f32
    %18 = vector.broadcast %cst_13 : f32 to vector<16x128xf32>
    %19 = arith.cmpf one, %4, %18 : vector<16x128xf32>
    %cst_14 = arith.constant 1.000000e+00 : f32
    %cst_15 = arith.constant 0.000000e+00 : f32
    %20 = vector.broadcast %cst_14 : f32 to vector<16x128xf32>
    %21 = vector.broadcast %cst_15 : f32 to vector<16x128xf32>
    %22 = arith.select %19, %20, %21 : vector<16x128xi1>, vector<16x128xf32>
    %cst_16 = arith.constant dense<0xFF800000> : vector<16xf32>
    %23 = vector.multi_reduction <maximumf>, %22, %cst_16 [1] : vector<16x128xf32> to vector<16xf32>
    %cst_17 = arith.constant 0.000000e+00 : f32
    %24 = vector.broadcast %cst_17 : f32 to vector<16xf32>
    %25 = arith.cmpf ogt, %23, %24 : vector<16xf32>
    %26 = vector.shape_cast %25 : vector<16xi1> to vector<16x1xi1>
    %27 = arith.extui %26 : vector<16x1xi1> to vector<16x1xi32>
    %28 = arith.sitofp %27 : vector<16x1xi32> to vector<16x1xf32>
    %cst_18 = arith.constant dense<0.000000e+00> : vector<8x1xf32>
    %29 = tpu.matmul %14, %28, %cst_18 {dimension_numbers = #tpu.dot_dimension_numbers<[1], [0], [0], [1], [0, 0, 1, 1], [], []>} : vector<8x16xf32>, vector<16x1xf32>, vector<8x1xf32> -> vector<8x1xf32>
    %cst_19 = arith.constant 1.000000e+00 : f32
    %30 = vector.broadcast %cst_19 : f32 to vector<8x1xf32>
    %31 = arith.maximumf %29, %30 : vector<8x1xf32>
    %32 = tpu.reciprocal %31 {approx = true} : vector<8x1xf32> -> vector<8x1xf32>
    %33 = vector.broadcast %32 : vector<8x1xf32> to vector<8x128xf32>
    %34 = arith.mulf %17, %33 : vector<8x128xf32>
    %35 = vector.extract_strided_slice %10 {offsets = [0, 0], sizes = [128, 128], strides = [1, 1]} : vector<256x128xf32> to vector<128x128xf32>
    %cst_20 = arith.constant dense<0.000000e+00> : vector<8x128xf32>
    %36 = tpu.matmul %16, %35, %cst_20 {dimension_numbers = #tpu.dot_dimension_numbers<[1], [0], [0], [1], [0, 0, 1, 1], [], []>} : vector<8x128xf32>, vector<128x128xf32>, vector<8x128xf32> -> vector<8x128xf32>
    %37 = vector.extract_strided_slice %10 {offsets = [128, 0], sizes = [128, 128], strides = [1, 1]} : vector<256x128xf32> to vector<128x128xf32>
    %cst_21 = arith.constant dense<0.000000e+00> : vector<8x128xf32>
    %38 = tpu.matmul %34, %37, %cst_21 {dimension_numbers = #tpu.dot_dimension_numbers<[1], [0], [0], [1], [0, 0, 1, 1], [], []>} : vector<8x128xf32>, vector<128x128xf32>, vector<8x128xf32> -> vector<8x128xf32>
    %39 = arith.addf %36, %38 : vector<8x128xf32>
    %40 = vector.broadcast %12 : vector<1x128xf32> to vector<8x128xf32>
    %41 = arith.addf %39, %40 : vector<8x128xf32>
    %cst_22 = arith.constant 0.000000e+00 : f32
    %42 = vector.broadcast %cst_22 : f32 to vector<8x128xf32>
    %43 = arith.cmpf ogt, %41, %42 : vector<8x128xf32>
    %cst_23 = arith.constant 0.00999999977 : f32
    %44 = vector.broadcast %cst_23 : f32 to vector<8x128xf32>
    %45 = arith.mulf %44, %41 : vector<8x128xf32>
    %46 = arith.select %43, %41, %45 : vector<8x128xi1>, vector<8x128xf32>
    %47 = arith.subf %46, %16 : vector<8x128xf32>
    %cst_24 = arith.constant dense<0.000000e+00> : vector<16x128xf32>
    %48 = tpu.matmul %13, %47, %cst_24 {dimension_numbers = #tpu.dot_dimension_numbers<[0], [0], [1], [1], [0, 1, 1, 1], [], []>} : vector<8x16xf32>, vector<8x128xf32>, vector<16x128xf32> -> vector<16x128xf32>
    %49 = arith.addf %4, %48 : vector<16x128xf32>
    %c0_25 = arith.constant 0 : index
    %c0_26 = arith.constant 0 : index
    %c0_27 = arith.constant 0 : index
    %50 = vector.load %arg6[%c0_25, %c0_26, %c0_27] : memref<1x16x128xf32, #tpu.memory_space<vmem>>, vector<1x16x128xf32>
    %51 = vector.shape_cast %50 : vector<1x16x128xf32> to vector<16x128xf32>
    %52 = vector.shape_cast %49 : vector<16x128xf32> to vector<1x16x128xf32>
    tpu.vector_store %arg6[%c0_25, %c0_26, %c0_27], %52 {strides = array<i32>} : memref<1x16x128xf32, #tpu.memory_space<vmem>>, vector<1x16x128xf32>,
    return
  }
  func.func @transform_0(%arg0: i32, %arg1: i32) -> (i32, i32, i32, i32) {
    %c0_i32 = arith.constant 0 : i32
    %c0_i32_0 = arith.constant 0 : i32
    %c0_i32_1 = arith.constant 0 : i32
    return %arg0, %arg1, %c0_i32, %c0_i32_0 : i32, i32, i32, i32
  }
  func.func @transform_1(%arg0: i32, %arg1: i32) -> (i32, i32, i32) {
    %c0_i32 = arith.constant 0 : i32
    %c0_i32_0 = arith.constant 0 : i32
    %c0_i32_1 = arith.constant 0 : i32
    return %arg1, %c0_i32, %c0_i32_0 : i32, i32, i32
  }
  func.func @transform_2(%arg0: i32, %arg1: i32) -> (i32, i32, i32) {
    %c0_i32 = arith.constant 0 : i32
    %c0_i32_0 = arith.constant 0 : i32
    %c0_i32_1 = arith.constant 0 : i32
    return %arg1, %c0_i32, %c0_i32_0 : i32, i32, i32
  }
  func.func @transform_3(%arg0: i32, %arg1: i32) -> (i32, i32, i32) {
    %c0_i32 = arith.constant 0 : i32
    %c0_i32_0 = arith.constant 0 : i32
    %c0_i32_1 = arith.constant 0 : i32
    return %arg0, %c0_i32, %c0_i32_0 : i32, i32, i32
  }
  func.func @transform_4(%arg0: i32, %arg1: i32) -> (i32, i32, i32) {
    %c0_i32 = arith.constant 0 : i32
    %c0_i32_0 = arith.constant 0 : i32
    %c0_i32_1 = arith.constant 0 : i32
    return %arg0, %c0_i32, %c0_i32_0 : i32, i32, i32
  }
}

</mosaic_0001>

<bundles_post_ra>
// kernel: tpu_custom_call.1
= control target key start
LH: loop header
LB: loop body
LE: loop exit
PB: predicated region body
PF: predicated region fallthrough
CT: control target
= control target key end

     0   :  { %s2153_s0 = inlined_call_operand.hbm [shape: s8[2,2,16,16], index: 0, kind: input, shape index: {}]   ;;  %s2154_s1 = inlined_call_operand.hbm [shape: f32[2,256,128], index: 1, kind: input, shape index: {}]   ;;  %s2155_s2 = inlined_call_operand.vmem [shape: f32[2,1,128], index: 2, kind: input, shape index: {}]   ;;  %s2156_s3 = inlined_call_operand.hbm [shape: f32[2,16,128], index: 3, kind: input, shape index: {}]   ;;  %s2157_s4 = inlined_call_operand.hbm [shape: f32[2,16,128], index: 4, kind: output, shape index: {}]  }
   0x1   :  { %2174 = sst [smem:[#allocation20_spill]] %s2154_s1 }
   0x2   :  { %2175 = sst [smem:[#allocation21_spill]] %s2155_s2 }
   0x3   :  { %2176 = sst [smem:[#allocation22_spill]] %s2157_s4 }
   0x4   :  { %9 = vsyncpa [#allocation3], 0 }
   0x5   :  { %11 = vsyncpa [#allocation3 + $0x1], 0 }
   0x6   :  { %12 = vsyncpa [#allocation6], 0 }
   0x7   :  { %14 = vsyncpa [#allocation6 + $0x1], 0 }
   0x8   :  { %15 = vsyncpa [#allocation4], 0 }
   0x9   :  { %17 = vsyncpa [#allocation4 + $0x1], 0  ;;  %s1635_s15 = smov 0   ;;  %s1637_s16 = smov 0  }
   0xa   :  { %s1639_s17 = smov 0   ;;  %s1641_s18 = smov 0  }
   0xb   :  { %s1643_s19 = smov 0   ;;  %s1645_s20 = smov 0  }
   0xc   :  { %s1647_s21 = smov 0   ;;  %s1649_s22 = smov 0  }
   0xd   :  { %s1651_s23 = smov 0   ;;  %s1653_s24 = smov 0  }
   0xe   :  { %s1655_s25 = smov 0   ;;  %s1657_s26 = smov 0  }
   0xf   :  { %s1659_s27 = smov 0   ;;  %s1661_s28 = smov 0  }
  0x10 LB: > { %2177 = sst [smem:[#allocation13_spill]] %s1561_s20  ;;  %s1704_s29 = sadd.s32 4294967295, %s1593_s28   ;;  %s1593_s28 = sphi %s1661_s28, %s23_s28   ;;  %s1589_s27 = sphi %s1659_s27, %s2235_s27   ;;  %s1585_s26 = sphi %s1657_s26, %s2234_s26   ;;  %s1581_s25 = sphi %s1655_s25, %s2233_s25   ;;  %s1577_s24 = sphi %s1653_s24, %s2232_s24   ;;  %s1573_s23 = sphi %s1651_s23, %s2231_s23   ;;  %s1569_s22 = sphi %s1649_s22, %s2230_s22   ;;  %s1565_s21 = sphi %s1647_s21, %s2229_s21   ;;  %s1561_s20 = sphi %s1645_s20, %s2228_s20   ;;  %s1557_s19 = sphi %s1643_s19, %s2227_s19   ;;  %s1553_s18 = sphi %s1641_s18, %s2226_s18   ;;  %s1549_s17 = sphi %s1639_s17, %s2225_s17   ;;  %s1545_s16 = sphi %s1637_s16, %s2224_s16   ;;  %s1541_s15 = sphi %s1635_s15, %s2223_s15  }
  0x11   : > { %2178 = sst [smem:[#allocation14_spill]] %s1577_s24  ;;  %s32_s30 = sadd.s32 1, %s1585_s26 }
  0x12   : > { %2179 = sst [smem:[#allocation15_spill]] %s1581_s25  ;;  %p1707_p0 = scmp.ge.s32.totalorder %s32_s30, 2 }
  0x13   : > { %p2162_p1 = scmp.eq.s32.totalorder %s1593_s28, 0  ;;  %p2161_p2 = scmp.eq.s32.totalorder %s1704_s29, 0 }
  0x14   : > { %s70_s6 = sadd.s32 1, %s1561_s20  ;;  %s2237_s30 = smov (%p1707_p0, %s32_s30), 0 }
  0x15   : > { %2181 = sst [smem:[#allocation16_spill]] %s2237_s30  ;;  %p77_p3 = scmp.ne.s32.totalorder %s1561_s20, %s1557_s19 }
  0x16   : > { %p83_p4 = scmp.ne.s32.totalorder %s1557_s19, %s1553_s18  ;;  %s1723_s7 = ssub.s32 %s1585_s26, %s2237_s30 }
  0x17   : > { %p68_p5 = scmp.eq.s32.totalorder %s1723_s7, 0  ;;  %p79_p6 = por %p77_p3, %p2162_p1 }
  0x18   : > { %p1730_p7 = por %p83_p4, %p2161_p2  ;;  %p2160_p8 = scmp.lt.s32.totalorder %s1593_s28, 4 }
  0x19   : > { %s1736_s9 = scalar_select %p68_p5, %s1561_s20, %s70_s6  }
  0x1a   : > { %s2182_s8 = scalar_select %p1730_p7, 1, 0 }
  0x1b   : > { %2184 = sst [smem:[#allocation18_spill]] %s1736_s9  ;;  %s208_s10 = sand.u32 1, %s1593_s28  }
  0x1c   : > { %2183 = sst [smem:[#allocation17_spill]] %s2182_s8  ;;  %s210_s11 = sand.u32 1, %s1561_s20  }
  0x1d   : > { %s976_s12 = sshll.u32 %s210_s11, 8  ;;  %s1003_s13 = sshll.u32 %s1585_s26, 12 }
  0x1e   : > { %s2185_s1 = sld [smem:[#allocation20_spill]]  ;;  %s212_s4 = scalar_lea.vmem [#allocation5], %s976_s12 }
  0x1f   : > { %s219_s25 = sshll.u32 %s212_s4, 4  ;;  %p1750_p9 = pnand %p2160_p8, %p79_p6  ;;  %s1746_s25 = int_to_ptr.vmem [resolvable:$true] %s219_s25 }
  0x20   : > { %s1755_s11 = scalar_lea.sflag [#allocation6], %s208_s10 }
  0x21   : > { %p1351_p12 = pneg %p1750_p9 }
  0x24   : > { %s1744_s30 = scalar_lea.hbm %s2185_s1, %s1003_s13  ;;  %s1354_s14 = scalar_lea.hbm %s2185_s1, 8192 }
  0x25   : > { %s1349_s13 = scalar_lea.hbm %s1744_s30, 4096  ;;  %p1355_p4 = scmp.lt.u32.totalorder %s1744_s30, %s2185_s1 }
  0x26   : > { %p1350_p11 = scmp.ne.s32.totalorder %s1744_s30, %s1349_s13  ;;  %p1356_p5 = scmp.lt.u32.totalorder %s1354_s14, %s1349_s13 }
  0x27   : > { %p1358_p8 = scmp.lt.u32.totalorder %s1349_s13, %s1744_s30 }
  0x28   : > { %p1352_p13 = pnand %p1351_p12, %p1350_p11  ;;  %p1357_p6 = por %p1356_p5, %p1355_p4 }
  0x2a   : > { %p1353_p3 = pneg %p1352_p13  ;;  %p1359_p2 = por %p1358_p8, %p1357_p6 }
  0x2c   : > { %p1360_p1 = pnand %p1359_p2, %p1353_p3 }
  0x2e   : > { %1363 = shalt.err (!%p1360_p1)
}
  0x2f   : > { %s1364_s10 = scalar_lea.vmem %s1746_s25, 4096  ;;  %s1595_s4 = smov [#allocation5]  }
  0x30   : > { %p1365_p11 = scmp.ne.s32.totalorder %s1746_s25, %s1364_s10  ;;  %s1369_s12 = sshll.u32 %s1595_s4, 4  ;;  %s1370_s12 = int_to_ptr.vmem [resolvable:$false] %s1369_s12 }
  0x31   : > { %s1371_s9 = scalar_lea.vmem %s1370_s12, 8192  ;;  %p1372_p7 = scmp.lt.s32.totalorder %s1746_s25, %s1370_s12 }
  0x32   : > { %p1367_p13 = pnand %p1365_p11, %p1351_p12  ;;  %p1373_p4 = scmp.lt.s32.totalorder %s1371_s9, %s1364_s10 }
  0x34   : > { %p1368_p10 = pneg %p1367_p13  ;;  %p1374_p5 = por %p1373_p4, %p1372_p7 }
  0x36   : > { %p1375_p8 = pnand %p1374_p5, %p1368_p10 }
  0x38   : > { %1378 = shalt.err (!%p1375_p8)
}
  0x39   : > { %s2164_s13 = smov 128   ;;  %s2165_s14 = smov 8  }
  0x3a   : > { %1212 = dma.hbm_to_vmem [thread:$0]  (!%p1750_p9), %s1744_s30, 4096, %s1746_s25, %s1755_s11, %s2164_s13, %s2164_s13, %s2165_s14  }
  0x3b   : > { %p254_p1 = scmp.lt.s32.totalorder %s1593_s28, 5  ;;  %p2187_p2 = scmp.ge.s32.totalorder %s1593_s28, 1 }
  0x3c   : > { %s35_s10 = sadd.s32 1, %s1589_s27  ;;  %s44_s4 = sadd.s32 1, %s1573_s23 }
  0x3d   : > { %p1789_p7 = pnand %p2187_p2, %p254_p1  ;;  %s2239_s10 = smov (!%p1707_p0, %s35_s10), %s1589_s27 }
  0x3e   : > { %p51_p10 = scmp.ne.s32.totalorder %s1573_s23, %s1569_s22  ;;  %p57_p12 = scmp.ne.s32.totalorder %s1569_s22, %s1565_s21 }
  0x3f   : > { %p37_p3 = scmp.ge.s32.totalorder %s2239_s10, 2  ;;  %s185_s6 = sand.u32 1, %s1573_s23  }
  0x40   : > { %p2189_p6 = scmp.eq.s32.totalorder %s1593_s28, 0  ;;  %p2191_p9 = scmp.eq.s32.totalorder %s1704_s29, 0 }
  0x41   : > { %s2241_s10 = smov (%p37_p3, %s2239_s10), 0  ;;  %s972_s5 = sshll.u32 %s185_s6, 2 }
  0x42   : > { %p1805_p11 = por %p2189_p6, %p51_p10  ;;  %p1811_p13 = por %p2191_p9, %p57_p12 }
  0x43   : > { %2193 = sst [smem:[#allocation19_spill]] %s2241_s10  ;;  %s1819_s12 = ssub.s32 %s1589_s27, %s2241_s10 }
  0x44   : > { %s2192_s30 = scalar_select %p1811_p13, 1, 0 }
  0x45   : > { %s41_s21 = sor.u32 %s1723_s7, %s1819_s12  ;;  %s973_s9 = sshll.u32 %s1585_s26, 1 }
  0x46   : > { %p42_p4 = scmp.eq.s32.totalorder %s41_s21, 0  ;;  %s974_s13 = sshll.u32 %s1589_s27, 2 }
  0x47   : > { %s189_s14 = scalar_lea.vmem [#allocation2], %s972_s5  ;;  %s195_s2 = sadd.s32 %s974_s13, %s973_s9 }
  0x48   : > { %s198_s1 = sshll.u32 %s189_s14, 4  ;;  %s975_s24 = sshll.u32 %s195_s2, 5  ;;  %s1829_s1 = int_to_ptr.vmem [resolvable:$true] %s198_s1 }
  0x49   : > { %s1827_s20 = scalar_select %p42_p4, %s1573_s23, %s44_s4  }
  0x4a   : > { %p2194_p5 = scmp.lt.s32.totalorder %s1593_s28, 4  ;;  %s1842_s21 = scalar_lea.hbm %s2153_s0, %s975_s24 }
  0x4b   : > { %s1844_s13 = scalar_lea.sflag [#allocation3], %s185_s6  ;;  %s1379_s2 = scalar_lea.hbm %s1842_s21, 64 }
  0x4c   : > { %p1835_p8 = pnand %p2194_p5, %p1805_p11  ;;  %p1380_p1 = scmp.ne.s32.totalorder %s1842_s21, %s1379_s2 }
  0x4d   : > { %s1384_s4 = scalar_lea.hbm %s2153_s0, 256  ;;  %p1385_p3 = scmp.lt.u32.totalorder %s1842_s21, %s2153_s0 }
  0x4e   : > { %p1381_p2 = pneg %p1835_p8  ;;  %p1386_p6 = scmp.lt.u32.totalorder %s1384_s4, %s1379_s2 }
  0x4f   : > { %p1388_p9 = scmp.lt.u32.totalorder %s1379_s2, %s1842_s21 }
  0x50   : > { %p1382_p10 = pnand %p1381_p2, %p1380_p1  ;;  %p1387_p11 = por %p1386_p6, %p1385_p3 }
  0x52   : > { %p1383_p12 = pneg %p1382_p10  ;;  %p1389_p4 = por %p1388_p9, %p1387_p11 }
  0x54   : > { %p1390_p5 = pnand %p1389_p4, %p1383_p12 }
  0x56   : > { %1393 = shalt.err (!%p1390_p5)
}
  0x57   : > { %s1394_s6 = scalar_lea.vmem %s1829_s1, 64  ;;  %s1598_s5 = smov [#allocation2]  }
  0x58   : > { %p1395_p1 = scmp.ne.s32.totalorder %s1829_s1, %s1394_s6  ;;  %s1399_s9 = sshll.u32 %s1598_s5, 4  ;;  %s1400_s9 = int_to_ptr.vmem [resolvable:$false] %s1399_s9 }
  0x59   : > { %s1401_s7 = scalar_lea.vmem %s1400_s9, 128  ;;  %p1402_p13 = scmp.lt.s32.totalorder %s1829_s1, %s1400_s9 }
  0x5a   : > { %p1397_p10 = pnand %p1395_p1, %p1381_p2  ;;  %p1403_p3 = scmp.lt.s32.totalorder %s1401_s7, %s1394_s6 }
  0x5c   : > { %p1398_p0 = pneg %p1397_p10  ;;  %p1404_p6 = por %p1403_p3, %p1402_p13 }
  0x5e   : > { %p1405_p11 = pnand %p1404_p6, %p1398_p0 }
  0x60   : > { %1408 = shalt.err (!%p1405_p11)
}
  0x61   : > { %s1599_s2 = smov 32   ;;  %s1600_s14 = smov 2  }
  0x62   : > { %1209 = dma.hbm_to_vmem [thread:$0]  (!%p1835_p8), %s1842_s21, 64, %s1829_s1, %s1844_s13, %s1599_s2, %s1599_s2, %s1600_s14  }
  0x63   : > { %s969_s8 = sadd.s32 4294967294, %s1593_s28   ;;  %s122_s4 = sadd.s32 1, %s1549_s17 }
  0x64   : > { %p2196_p13 = scmp.eq.s32.totalorder %s1819_s12, 0  ;;  %p129_p0 = scmp.ne.s32.totalorder %s1549_s17, %s1545_s16 }
  0x65   : > { %p135_p2 = scmp.ne.s32.totalorder %s1545_s16, %s1541_s15  ;;  %p159_p12 = scmp.eq.s32.totalorder %s1704_s29, 3 }
  0x66   : > { %s1877_s24 = scalar_select %p2196_p13, %s1549_s17, %s122_s4  }
  0x67   : > { %p165_p9 = scmp.eq.s32.totalorder %s969_s8, 3  ;;  %p2197_p4 = scmp.eq.s32.totalorder %s1593_s28, 0 }
  0x68   : > { %p2198_p1 = scmp.eq.s32.totalorder %s1704_s29, 0  ;;  %p1892_p3 = por %p159_p12, %p129_p0 }
  0x69   : > { %p131_p5 = por %p129_p0, %p2197_p4  ;;  %p1896_p8 = por %p165_p9, %p135_p2 }
  0x6a   : > { %p1888_p10 = por %p135_p2, %p2198_p1  ;;  %s237_s12 = sand.u32 1, %s1549_s17  }
  0x6b   : > { %s2200_s10 = scalar_select %p1892_p3, 1, 0 }
  0x6c   : > { %s2199_s25 = scalar_select %p1888_p10, 1, 0 }
  0x6d   : > { %s2201_s1 = scalar_select %p1896_p8, 1, 0 }
  0x6e   : > { %s1004_s21 = sshll.u32 %s1589_s27, 8  ;;  %s979_s13 = sshll.u32 %s237_s12, 4 }
  0x6f   : > { %s1905_s9 = scalar_lea.hbm %s2156_s3, %s1004_s21  ;;  %p2202_p6 = scmp.lt.s32.totalorder %s1593_s28, 4 }
  0x70   : > { %s239_s2 = scalar_lea.vmem [#allocation7], %s979_s13  ;;  %s1409_s8 = scalar_lea.hbm %s1905_s9, 256 }
  0x71   : > { %p1909_p11 = pnand %p2202_p6, %p131_p5  ;;  %s246_s14 = sshll.u32 %s239_s2, 4  ;;  %s1913_s14 = int_to_ptr.vmem [resolvable:$true] %s246_s14 }
  0x72   : > { %p1410_p13 = scmp.ne.s32.totalorder %s1905_s9, %s1409_s8  ;;  %s1414_s21 = scalar_lea.hbm %s2156_s3, 512 }
  0x73   : > { %p1411_p0 = pneg %p1909_p11  ;;  %p1415_p9 = scmp.lt.u32.totalorder %s1905_s9, %s2156_s3 }
  0x74   : > { %p1416_p4 = scmp.lt.u32.totalorder %s1414_s21, %s1409_s8  ;;  %p1418_p1 = scmp.lt.u32.totalorder %s1409_s8, %s1905_s9 }
  0x75   : > { %p1412_p2 = pnand %p1411_p0, %p1410_p13 }
  0x76   : > { %p1417_p5 = por %p1416_p4, %p1415_p9 }
  0x77   : > { %p1413_p12 = pneg %p1412_p2 }
  0x78   : > { %p1419_p6 = por %p1418_p1, %p1417_p5 }
  0x7a   : > { %p1420_p8 = pnand %p1419_p6, %p1413_p12 }
  0x7c   : > { %1423 = shalt.err (!%p1420_p8)
}
  0x7d   : > { %s1424_s13 = scalar_lea.vmem %s1913_s14, 256  ;;  %s1601_s2 = smov [#allocation7]  }
  0x7e   : > { %p1425_p13 = scmp.ne.s32.totalorder %s1913_s14, %s1424_s13  ;;  %s1429_s4 = sshll.u32 %s1601_s2, 4  ;;  %s1430_s4 = int_to_ptr.vmem [resolvable:$false] %s1429_s4 }
  0x7f   : > { %s1431_s12 = scalar_lea.vmem %s1430_s4, 512  ;;  %p1432_p10 = scmp.lt.s32.totalorder %s1913_s14, %s1430_s4 }
  0x80   : > { %p1427_p2 = pnand %p1425_p13, %p1411_p0  ;;  %p1433_p9 = scmp.lt.s32.totalorder %s1431_s12, %s1424_s13 }
  0x82   : > { %p1428_p3 = pneg %p1427_p2  ;;  %p1434_p4 = por %p1433_p9, %p1432_p10 }
  0x84   : > { %p1435_p5 = pnand %p1434_p4, %p1428_p3 }
  0x86   : > { %1438 = shalt.err (!%p1435_p5)
}
  0x87   : > { %s2204_s8 = smov 8   ;;  %s2205_s21 = smov 128  }
  0x88   : > { %1215 = dma.hbm_to_vmem [thread:$0]  (!%p1909_p11), %s1905_s9, 256, %s1913_s14, %s1755_s11, %s2205_s21, %s2205_s21, %s2204_s8  }
  0x89   : > { %258 = sbr.rel (%p1789_p7) target bundleno = 1136 (0x470), region = 36  ;;  %s260_s6 = sand.u32 (!%p1789_p7), 1, %s1569_s22  }
  0x8a   : > { %s1947_s5 = sshll.u32 (!%p1789_p7), %s260_s6, 2  ;;  %s261_s13 = scalar_lea.sflag (!%p1789_p7), [#allocation3], %s260_s6 }
  0x8b   : > { %s264_s2 = scalar_lea.vmem (!%p1789_p7), [#allocation2], %s1947_s5  ;;  %p2206_p10 = scmp.ne.s32.totalorder (!%p1789_p7), %s2192_s30, 0 }
  0x90   : > { %1524 = dma.done.wait (%p2206_p10), %s261_s13, 64  }
  0x91   : > { %1526 = vsyncadd (%p2206_p10), %s261_s13, 4294967232  ;;  %s2207_s7 = sld [smem:[#allocation17_spill]]  ;;  %s269_s11 = sand.u32 1, %s1704_s29  }
  0x92   : > { %s271_s9 = sand.u32 1, %s1557_s19   ;;  %s270_s14 = scalar_lea.sflag [#allocation6], %s269_s11 }
  0x93   : > { %s984_s18 = sshll.u32 %s271_s9, 8 }
  0x94   : > { %s1956_s4 = scalar_lea.vmem [#allocation5], %s984_s18 }
  0x97   : > { %p2208_p7 = scmp.ne.s32.totalorder %s2207_s7, 0 }
  0x99   : > { %1528 = dma.done.wait (%p2208_p7), %s270_s14, 4096  }
  0x9a   : > { %1530 = vsyncadd (%p2208_p7), %s270_s14, 4294963200  ;;  %s280_s12 = sand.u32 1, %s1545_s16   ;;  %p2209_p3 = scmp.ne.s32.totalorder %s2199_s25, 0 }
  0x9b   : > { %s985_s30 = sshll.u32 %s280_s12, 4 }
  0x9c   : > { %s282_s8 = scalar_lea.vmem [#allocation7], %s985_s30 }
  0x9d   : > { %1532 = dma.done.wait (%p2209_p3), %s270_s14, 256  }
  0x9e   : > { %1534 = vsyncadd (%p2209_p3), %s270_s14, 4294967040  ;;  %s2210_s29 = sld [smem:[#allocation14_spill]]  ;;  %s2211_s7 = sld [smem:[#allocation21_spill]] }
  0x9f   : > { %s1977_s9 = scalar_lea.vmem [#allocation8], %s985_s30 }
  0xa4   : > { %p320_p8 = scmp.lt.s32.totalorder %s2210_s29, 1  ;;  %p987_p11 = scmp.ne.s32.totalorder %s2210_s29, 0 }
  0xa5   : > { %v327_v0 = vld [vmem:[%s282_s8] sm:$0xff] (!%p987_p11)  ;;  %v328_v1 = vld [vmem:[%s282_s8 + $0x8] sm:$0xff] (!%p987_p11) }
  0xa6   : > { %s1971_s21 = scalar_select %p320_p8, %s2210_s29, 1 }
  0xa7   : > { %326 = sbr.rel (%p987_p11) target bundleno = 174 (0xae), region = 52  ;;  %329 = vst [vmem:[%s1977_s9] sm:$0xff] (!%p987_p11), %v327_v0  ;;  %330 = vst [vmem:[%s1977_s9 + $0x8] sm:$0xff] (!%p987_p11), %v328_v1 }
  0xa8   : > { %s322_s11 = scalar_lea.vmem %s2211_s7, %s1971_s21 }
  0xae PF: > { %v1983_v2 = vld [vmem:[%s1977_s9] sm:$0xff]  ;;  %v1986_v3 = vld [vmem:[%s1977_s9 + $0x8] sm:$0xff]  ;;  %v1602_v4 = vmov 0.0   ;;  %v1603_v7 = vmov 0.0|0.0   ;;  %vm1604_vm2 = vmmov 0   ;;  %vm372_vm3 = vcmask 130048  }
  0xaf   : > { %vm454_vm0 = vcmp.ne.f32.partialorder %v1983_v2, 0.0  ;;  %vm455_vm1 = vcmp.ne.f32.partialorder %v1986_v3, 0.0  ;;  %1147 = vmatprep.subr.bf16.mxu1 %v1603_v7  ;;  %v1007_v8 = vld [vmem:[%s264_s2] sm:$0xf]   ;;  %1065 = vmatprep.mubr.msk.f32.mxu1 %vm1604_vm2, %v1602_v4  ;;  %v1143_v10 = vpack.c.bf16 %v1986_v3, %v1983_v2  ;;  %v1605_v16 = vmov 1.0|1.0  }
  0xb0   : > { %v456_v5 = vsel %vm454_vm0, 1.0, %v1602_v4  ;;  %v457_v6 = vsel %vm455_vm1, 1.0, %v1602_v4  ;;  %v1009_v9 = vunpack.c.1.s8 %v1007_v8  ;;  %v1008_v11 = vunpack.c.0.s8 %v1007_v8  ;;  %v339_v18 = vld [vmem:[%s1956_s4] sm:$0xff]  ;;  %v340_v19 = vld [vmem:[%s1956_s4 + $0x8] sm:$0xff]  ;;  %v341_v24 = vld [vmem:[%s1956_s4 + $0x10] sm:$0xff]  ;;  %s2212_s25 = sld [smem:[#allocation15_spill]] }
  0xb1   : > { %458 = vmax.xlane.f32.xlu0 %v456_v5  ;;  %1144 = vmatprep.subr.bf16.mxu0 %v1143_v10  ;;  %v1606_v17 = vmov 0   ;;  %v355_v20 = vld [vmem:[%s1956_s4 + $0x80] sm:$0xff]  ;;  %v1175_v22 = vpack.c.bf16 %v340_v19, %v339_v18  ;;  %v356_v23 = vld [vmem:[%s1956_s4 + $0x88] sm:$0xff]  ;;  %v342_v25 = vld [vmem:[%s1956_s4 + $0x18] sm:$0xff]  ;;  %vm729_vm7 = vcmask 64512   ;;  %s2214_s29 = sld [smem:[#allocation22_spill]] }
  0xb2   : > { %v1996_v12 = vcvt.s32.f32 %v1008_v11  ;;  %1146 = vmatpush3.bf16.msra.mxu0 %v1143_v10  ;;  %v338_v13 = vcvt.s32.f32 %v1009_v9  ;;  %1345 = vset.pattern.permute.xlu1 %v1606_v17  ;;  %v1151_v27 = vpack.c.bf16 %v356_v23, %v355_v20  ;;  %v357_v28 = vld [vmem:[%s1956_s4 + $0x90] sm:$0xff]  ;;  %v358_v29 = vld [vmem:[%s1956_s4 + $0x98] sm:$0xff]  ;;  %v1178_v30 = vpack.c.bf16 %v342_v25, %v341_v24  ;;  %v343_v32 = vld [vmem:[%s1956_s4 + $0x20] sm:$0xff]  ;;  %s2077_s6 = scalar_lea.sflag [#allocation4], %s280_s12  ;;  %p2215_p12 = scmp.ne.s32.totalorder %s2200_s10, 0 }
  0xb3   : > { %1150 = vmatprep.subr.bf16.mxu0 %v1603_v7  ;;  %1346 = vset.pattern.permute.xlu0 %v1606_v17  ;;  %v1154_v31 = vpack.c.bf16 %v358_v29, %v357_v28  ;;  %v344_v33 = vld [vmem:[%s1956_s4 + $0x28] sm:$0xff]  ;;  %v359_v34 = vld [vmem:[%s1956_s4 + $0xa0] sm:$0xff]  ;;  %v345_v38 = vld [vmem:[%s1956_s4 + $0x30] sm:$0xff]  ;;  %s1607_s7 = smov [#allocation8]  }
  0xb4   : > { %1058 = vmatprep.mubr.msk.f32.mxu0 %vm372_vm3, %v1996_v12  ;;  %v360_v35 = vld [vmem:[%s1956_s4 + $0xa8] sm:$0xff]  ;;  %v1181_v36 = vpack.c.bf16 %v344_v33, %v343_v32  ;;  %v346_v39 = vld [vmem:[%s1956_s4 + $0x38] sm:$0xff]  ;;  %v361_v40 = vld [vmem:[%s1956_s4 + $0xb0] sm:$0xff] }
  0xb5   : > { %460 = vmax.xlane.f32.xlu0 %v457_v6  ;;  %1059 = vmatmul.mubr.msk.f32.vlgmr.msra.gmra.mrb[0].mxu0 %vm372_vm3, %v338_v13  ;;  %v1157_v37 = vpack.c.bf16 %v360_v35, %v359_v34  ;;  %v362_v41 = vld [vmem:[%s1956_s4 + $0xb8] sm:$0xff]  ;;  %v1184_v42 = vpack.c.bf16 %v346_v39, %v345_v38  ;;  %v347_v44 = vld [vmem:[%s1956_s4 + $0x40] sm:$0xff]  ;;  %v348_v45 = vld [vmem:[%s1956_s4 + $0x48] sm:$0xff] }
  0xb6   : > { %1100 = vmatprep.mubr.msk.f32.mxu0 %vm1604_vm2, %v1602_v4  ;;  %1152 = vmatpush3.bf16.msra.mxu0 %v1151_v27  ;;  %v1160_v43 = vpack.c.bf16 %v362_v41, %v361_v40  ;;  %v363_v46 = vld [vmem:[%s1956_s4 + $0xc0] sm:$0xff]  ;;  %v364_v47 = vld [vmem:[%s1956_s4 + $0xc8] sm:$0xff]  ;;  %v1187_v48 = vpack.c.bf16 %v348_v45, %v347_v44  ;;  %v349_v50 = vld [vmem:[%s1956_s4 + $0x50] sm:$0xff]  ;;  %s1005_s14 = sshll.u32 %s2212_s25, 8 }
  0xb7   : > { %1153 = vmatprep.subr.bf16.mxu0 %v1603_v7  ;;  %v1163_v49 = vpack.c.bf16 %v364_v47, %v363_v46  ;;  %v350_v51 = vld [vmem:[%s1956_s4 + $0x58] sm:$0xff]  ;;  %v365_v52 = vld [vmem:[%s1956_s4 + $0xd0] sm:$0xff]  ;;  %v351_v56 = vld [vmem:[%s1956_s4 + $0x60] sm:$0xff]  ;;  %s2068_s21 = scalar_lea.hbm %s2214_s29, %s1005_s14 }
  0xb8   : > { %v366_v53 = vld [vmem:[%s1956_s4 + $0xd8] sm:$0xff]  ;;  %v1190_v54 = vpack.c.bf16 %v350_v51, %v349_v50  ;;  %v352_v57 = vld [vmem:[%s1956_s4 + $0x68] sm:$0xff]  ;;  %v367_v58 = vld [vmem:[%s1956_s4 + $0xe0] sm:$0xff] }
  0xb9   : > { %v1166_v55 = vpack.c.bf16 %v366_v53, %v365_v52  ;;  %v368_v59 = vld [vmem:[%s1956_s4 + $0xe8] sm:$0xff]  ;;  %v1193_v60 = vpack.c.bf16 %v352_v57, %v351_v56  ;;  %v353_v62 = vld [vmem:[%s1956_s4 + $0x70] sm:$0xff]  ;;  %v354_v63 = vld [vmem:[%s1956_s4 + $0x78] sm:$0xff] }
  0xba   : > { %1155 = vmatpush3.bf16.msra.mxu0 %v1154_v31  ;;  %v1169_v61 = vpack.c.bf16 %v368_v59, %v367_v58  ;;  %v1196_v0 = vpack.c.bf16 %v354_v63, %v353_v62  ;;  %v369_v6 = vld [vmem:[%s1956_s4 + $0xf0] sm:$0xff]  ;;  %v370_v8 = vld [vmem:[%s1956_s4 + $0xf8] sm:$0xff]  ;;  %s829_s4 = sshll.u32 %s1977_s9, 4  ;;  %s2070_s4 = int_to_ptr.vmem [resolvable:$true] %s829_s4 }
  0xbb   : > { %1156 = vmatprep.subr.bf16.mxu0 %v1603_v7  ;;  %v1172_v9 = vpack.c.bf16 %v370_v8, %v369_v6  ;;  %s1439_s13 = scalar_lea.vmem %s2070_s4, 256 }
  0xbc   : > { %p1440_p0 = scmp.ne.s32.totalorder %s2070_s4, %s1439_s13 }
  0xbe   : > { %1158 = vmatpush3.bf16.msra.mxu0 %v1157_v37  ;;  %p1441_p1 = pnand %p1440_p0, %p2215_p12 }
  0xbf   : > { %1159 = vmatprep.subr.bf16.mxu0 %v1603_v7 }
  0xc0   : > { %p1442_p6 = pneg %p1441_p1 }
  0xc2   : > { %1161 = vmatpush3.bf16.msra.mxu0 %v1160_v43 }
  0xc3   : > { %1162 = vmatprep.subr.bf16.mxu0 %v1603_v7 }
  0xc6   : > { %1164 = vmatpush3.bf16.msra.mxu0 %v1163_v49 }
  0xc7   : > { %1165 = vmatprep.subr.bf16.mxu0 %v1603_v7 }
  0xca   : > { %1167 = vmatpush3.bf16.msra.mxu0 %v1166_v55 }
  0xcb   : > { %1168 = vmatprep.subr.bf16.mxu0 %v1603_v7 }
  0xce   : > { %1170 = vmatpush3.bf16.msra.mxu0 %v1169_v61 }
  0xcf   : > { %1171 = vmatprep.subr.bf16.mxu0 %v1603_v7 }
  0xd2   : > { %1173 = vmatpush3.bf16.msra.mxu0 %v1172_v9 }
 0x13e   : > { %v459_v14 = vpop.xlane.xlu0 %458 }
 0x13f   : > { %vm462_vm4 = vcmp.gt.f32.partialorder %v459_v14, 0.0 }
 0x142   : > { %v461_v15 = vpop.xlane.xlu0 %460 }
 0x143   : > { %vm463_vm5 = vcmp.gt.f32.partialorder %v461_v15, 0.0 }
 0x144   : > { %vm1148_vm6 = vmpackc.low %vm463_vm5, %vm462_vm4 }
 0x145   : > { %1149 = vmatpush3.bf16.msk.msra.mxu1 %vm1148_vm6, %v1605_v16  ;;  %v995_v16 = vld [vmem:[%s322_s11] ss:$0 sm:$0xff]  ;;  %s1443_s11 = sshll.u32 %s1607_s7, 4  ;;  %s1444_s11 = int_to_ptr.vmem [resolvable:$false] %s1443_s11 }
 0x146   : > { %1174 = vmatprep.subr.bf16.mxu1 %v1603_v7  ;;  %s1445_s25 = scalar_lea.vmem %s1444_s11, 512  ;;  %p1446_p13 = scmp.lt.s32.totalorder %s2070_s4, %s1444_s11 }
 0x147   : > { %p1447_p2 = scmp.lt.s32.totalorder %s1445_s25, %s1439_s13 }
 0x148   : > { %1066 = vmatmul.mubr.msk.f32.vlgmr.msra.gmra.mrb[0].mxu1 %vm372_vm3, %v338_v13 }
 0x149   : > { %1135 = vmatprep.mubr.msk.f32.mxu1 %vm1604_vm2, %v1602_v4  ;;  %1176 = vmatpush3.bf16.msra.mxu1 %v1175_v22  ;;  %p1448_p9 = por %p1447_p2, %p1446_p13 }
 0x14a   : > { %1177 = vmatprep.subr.bf16.mxu1 %v1603_v7 }
 0x14b   : > { %p1449_p4 = pnand %p1448_p9, %p1442_p6 }
 0x14d   : > { %1179 = vmatpush3.bf16.msra.mxu1 %v1178_v30 }
 0x14e   : > { %1180 = vmatprep.subr.bf16.mxu1 %v1603_v7 }
 0x151   : > { %1182 = vmatpush3.bf16.msra.mxu1 %v1181_v36 }
 0x152   : > { %1183 = vmatprep.subr.bf16.mxu1 %v1603_v7 }
 0x155   : > { %1185 = vmatpush3.bf16.msra.mxu1 %v1184_v42 }
 0x156   : > { %1186 = vmatprep.subr.bf16.mxu1 %v1603_v7 }
 0x159   : > { %1188 = vmatpush3.bf16.msra.mxu1 %v1187_v48 }
 0x15a   : > { %1189 = vmatprep.subr.bf16.mxu1 %v1603_v7 }
 0x15d   : > { %1191 = vmatpush3.bf16.msra.mxu1 %v1190_v54 }
 0x15e   : > { %1192 = vmatprep.subr.bf16.mxu1 %v1603_v7 }
 0x161   : > { %1194 = vmatpush3.bf16.msra.mxu1 %v1193_v60 }
 0x162   : > { %1195 = vmatprep.subr.bf16.mxu1 %v1603_v7 }
 0x165   : > { %1197 = vmatpush3.bf16.msra.mxu1 %v1196_v0 }
 0x188   : > { %v2006_v21 = vpop.f32.mrb[0].mxu0 }
 0x189   : > { %v2011_v26 = vpop.f32.mrb[1].mxu0 }
 0x18a   : > { %1136 = vmatmul.mubr.f32.vlgmr.msra.gmra.mrb[2].mxu1 %v2011_v26 }
 0x21b   : > { %v534_v1 = vpop.f32.mrb[0].mxu1 }
 0x21c   : > { %v538_v4 = vmax.f32 %v534_v1, 1.0  ;;  %v1067_v5 = vpop.f32.mrb[1].mxu1 }
 0x21e   : > { %1347 = vrcp.f32 %v538_v4 }
 0x228   : > { %v1348_v10 = vpop.eup %1347 }
 0x229   : > { %542 = vperm.xlu1 %1345, %v1348_v10  }
 0x252   : > { %697 = vxpose.xlu1.b32.start.end [1/1] (short) (narrow) %v1996_v12, 16 }
 0x25d   : > { %v682_v11 = vpop.f32.mrb[2].mxu1 }
 0x25e   : > { %v1137_v13 = vpop.f32.mrb[3].mxu1 }
 0x2a8   : > { %v543_v14 = vpop.permute.xlu1 %542 }
 0x2a9   : > { %v545_v7 = vmul.f32 %v2006_v21, %v543_v14 }
 0x2ab   : > { %1101 = vmatmul.mubr.f32.vlgmr.msra.gmra.mrb[2].mxu0 %v545_v7 }
 0x2d2   : > { %v713_v15 = vpop.trf.xlu1 }
 0x2d3   : > { %1140 = vmatprep.mubr.msk.f32.mxu0 %vm729_vm7, %v713_v15 }
 0x2d6   : > { %v714_v23 = vpop.trf.xlu1 }
 0x37e   : > { %v612_v17 = vpop.f32.mrb[2].mxu0 }
 0x37f   : > { %v683_v18 = vadd.f32 %v682_v11, %v612_v17  ;;  %v1102_v19 = vpop.f32.mrb[3].mxu0 }
 0x381   : > { %v692_v12 = vadd.f32 %v995_v16, %v683_v18 }
 0x383   : > { %vm693_vm8 = vcmp.gt.f32.partialorder %v692_v12, 0.0  ;;  %v694_v20 = vmul.f32 0.01, %v692_v12 }
 0x385   : > { %v695_v21 = vsel %vm693_vm8, %v692_v12, %v694_v20 }
 0x386   : > { %v696_v22 = vsub.f32 %v695_v21, %v2011_v26 }
 0x388   : > { %1138 = vmatprep.subr.mxu0 %v696_v22 }
 0x389   : > { %1139 = vmatpush3.msra.mxu0 %v696_v22 }
 0x38a   : > { %1141 = vmatmul.mubr.msk.f32.vlgmr.msra.gmra.mrb[4].mxu0 %vm729_vm7, %v714_v23 }
 0x45d   : > { %v1142_v24 = vpop.f32.mrb[4].mxu0 }
 0x45e   : > { %v812_v25 = vadd.f32 %v1142_v24, %v1986_v3  ;;  %v802_v27 = vpop.f32.mrb[5].mxu0 }
 0x45f   : > { %v811_v26 = vadd.f32 %v802_v27, %v1983_v2 }
 0x460   : > { %814 = vst [vmem:[%s1977_s9 + $0x8] sm:$0xff] %v812_v25 }
 0x461   : > { %813 = vst [vmem:[%s1977_s9] sm:$0xff] %v811_v26 }
 0x462   : > { %1452 = shalt.err (!%p1449_p4)
}
 0x463   : > { %s1453_s12 = scalar_lea.hbm %s2068_s21, 256  ;;  %s1457_s2 = scalar_lea.hbm %s2214_s29, 512 }
 0x464   : > { %p1454_p5 = scmp.ne.s32.totalorder %s2068_s21, %s1453_s12  ;;  %p1458_p3 = scmp.lt.u32.totalorder %s2068_s21, %s2214_s29 }
 0x465   : > { %p1459_p8 = scmp.lt.u32.totalorder %s1457_s2, %s1453_s12  ;;  %p1461_p0 = scmp.lt.u32.totalorder %s1453_s12, %s2068_s21 }
 0x466   : > { %p1455_p10 = pnand %p1454_p5, %p2215_p12 }
 0x467   : > { %p1460_p11 = por %p1459_p8, %p1458_p3 }
 0x468   : > { %p1456_p7 = pneg %p1455_p10 }
 0x469   : > { %p1462_p1 = por %p1461_p0, %p1460_p11 }
 0x46b   : > { %p1463_p6 = pnand %p1462_p1, %p1456_p7 }
 0x46d   : > { %1466 = shalt.err (!%p1463_p6)
}
 0x46e   : > { %s1608_s30 = smov 128   ;;  %s1609_s8 = smov 8  }
 0x46f   : > { %1204 = dma.vmem_to_hbm [thread:$0]  (%p2215_p12), %s2070_s4, 256, %s2068_s21, %s2077_s6, %s1608_s30, %s1608_s30, %s1609_s8  }
 0x470 PF: > { %p1221_p13 = scmp.ge.s32.totalorder %s1593_s28, 2  ;;  %s844_s13 = sand.u32 1, %s1541_s15  }
 0x471   : > { %p2216_p2 = scmp.ne.s32.totalorder %s2201_s1, 0  ;;  %s845_s7 = scalar_lea.sflag [#allocation4], %s844_s13 }
 0x473   : > { %p1217_p9 = pnand %p1221_p13, %p2216_p2 }
 0x475   : > { %1536 = dma.done.wait (!%p1217_p9), %s845_s7, 256  }
 0x476   : > { %1538 = vsyncadd (!%p1217_p9), %s845_s7, 4294967040  ;;  %s23_s28 = sadd.s32 1, %s1593_s28   ;;  %s2218_s10 = sld [smem:[#allocation13_spill]] }
 0x477   : > { %p2106_p4 = scmp.ge.s32.totalorder %s23_s28, 6   ;;  %s2219_s4 = sld [smem:[#allocation18_spill]] }
 0x478   : > { %s2220_s6 = smov %s1827_s20  ;;  %s2221_s1 = sld [smem:[#allocation16_spill]] }
 0x479   : > { %s2222_s12 = sld [smem:[#allocation19_spill]]  ;;  %s2223_s15 = smov %s1545_s16 }
 0x47a   : > { %s2224_s16 = smov %s1549_s17  ;;  %s2225_s17 = smov %s1877_s24 }
 0x47b   : > { %s2226_s18 = smov %s1557_s19  ;;  %s2229_s21 = smov %s1569_s22 }
 0x47c   : > { %s2227_s19 = smov %s2218_s10  ;;  %s2230_s22 = smov %s1573_s23 }
 0x47d   : > { %s2228_s20 = smov %s2219_s4  ;;  %s2231_s23 = smov %s2220_s6 }
 0x47e   : > { %s2232_s24 = smov %s1585_s26  ;;  %s2233_s25 = smov %s1589_s27 }
 0x47f   : > { %s2234_s26 = smov %s2221_s1  ;;  %s2235_s27 = smov %s2222_s12 }
 0x480   :  { %22 = sbr.rel (!%p2106_p4) target bundleno = 16 (0x10), region = 112 }
 0x487   :  { %850 = vsyncpa [#allocation3], 1 }
 0x488   :  { %852 = vsyncpa [#allocation3 + $0x1], 1 }
 0x489   :  { %853 = vsyncpa [#allocation6], 1 }
 0x48a   :  { %855 = vsyncpa [#allocation6 + $0x1], 1 }
 0x48b   :  { %856 = vsyncpa [#allocation4], 1 }
 0x48c   :  { %858 = vsyncpa [#allocation4 + $0x1], 1 }

</bundles_post_ra>
